<compile_context>
chip_gen: v7x
topology: tpu7x:2x2x1
jax: 0.10.0
libtpu: 0.0.40
codegen_flags: <defaults>
</compile_context>

<pallas_src>
import math

import jax
import jax.numpy as jnp
from jax import lax
from jax.experimental import pallas as pl
from jax.experimental.pallas import tpu as pltpu


_NEG_INF = -1e20            # matches masked_fill(-1e20) in the (non-AMP) PyTorch module
_VMEM_LIMIT = 48 * 1024 * 1024   # headroom under v7x's 64 MiB/TC; fine on v5e/v6e too


def _pick_tile(n, target, step):
    """Largest multiple of `step` <= target dividing n, else n (full dim is always legal)."""
    if n <= target:
        return n
    d = (target // step) * step
    while d >= step:
        if n % d == 0:
            return d
        d -= step
    return n


def _make_qkv_kernel(mxu_dtype, precision, inv_scale):
    f32 = jnp.float32

    def kernel(q_ref, k_ref, v_ref,
               wq_ref, bq_ref, wk_ref, bk_ref, wv_ref, bv_ref,
               qp_ref, kp_ref, vp_ref):
        def proj(x_ref, w_ref, b_ref):
            x = x_ref[...].astype(mxu_dtype)
            w = w_ref[...].astype(mxu_dtype)
            y = jnp.dot(x, w, precision=precision, preferred_element_type=f32)
            return y + b_ref[...].astype(f32)

        # Fold 1/query_scale into the Q projection once (cheaper than scaling logits).
        qp_ref[...] = (proj(q_ref, wq_ref, bq_ref) * inv_scale).astype(qp_ref.dtype)
        kp_ref[...] = proj(k_ref, wk_ref, bk_ref).astype(kp_ref.dtype)
        vp_ref[...] = proj(v_ref, wv_ref, bv_ref).astype(vp_ref.dtype)

    return kernel


def _make_linear_kernel(mxu_dtype, precision):
    f32 = jnp.float32

    def kernel(x_ref, w_ref, b_ref, o_ref):
        x = x_ref[...].astype(mxu_dtype)
        w = w_ref[...].astype(mxu_dtype)
        y = jnp.dot(x, w, precision=precision, preferred_element_type=f32)
        o_ref[...] = (y + b_ref[...].astype(f32)).astype(o_ref.dtype)

    return kernel


def _make_attn_kernel(has_mask, mxu_dtype, precision, approx_recip):
    f32 = jnp.float32

    def body(mask_tile, q_ref, k_ref, v_ref, o_ref, m_sc, l_sc, acc_sc):
        ki = pl.program_id(2)

        @pl.when(ki == 0)
        def _():
            m_sc[...] = jnp.full(m_sc.shape, -jnp.inf, f32)
            l_sc[...] = jnp.zeros(l_sc.shape, f32)
            acc_sc[...] = jnp.zeros(acc_sc.shape, f32)

        # q already carries the 1/query_scale factor from the projection kernel.
        q = q_ref[0].astype(mxu_dtype)                      # (TQ, dh)
        k = k_ref[0].astype(mxu_dtype)                      # (TK, dh)
        s = lax.dot_general(q, k, (((1,), (1,)), ((), ())),
                            precision=precision,
                            preferred_element_type=f32)     # (TQ, TK)
        if has_mask:
            s = jnp.where(mask_tile.astype(jnp.int32) != 0, _NEG_INF, s)

        m_prev = m_sc[...]
        m_new = jnp.maximum(m_prev, jnp.max(s, axis=-1, keepdims=True))
        alpha = jnp.exp(m_prev - m_new)
        p = jnp.exp(s - m_new)
        # TODO(synk): nn.Dropout(cfg.dropout) on attention weights is treated as
        # identity (eval/inference mode); cfg.dropout is not defined in the spec.
        l_sc[...] = alpha * l_sc[...] + jnp.sum(p, axis=-1, keepdims=True)
        acc_sc[...] = alpha * acc_sc[...] + jnp.dot(
            p.astype(mxu_dtype), v_ref[0].astype(mxu_dtype),
            precision=precision, preferred_element_type=f32)
        m_sc[...] = m_new

        @pl.when(ki == pl.num_programs(2) - 1)
        def _():
            l = l_sc[...]
            inv_l = pl.reciprocal(l, approx=True) if approx_recip else 1.0 / l
            o_ref[0] = (acc_sc[...] * inv_l).astype(o_ref.dtype)

    if has_mask:
        def kernel(mask_ref, q_ref, k_ref, v_ref, o_ref, m_sc, l_sc, acc_sc):
            body(mask_ref[0], q_ref, k_ref, v_ref, o_ref, m_sc, l_sc, acc_sc)
    else:
        def kernel(q_ref, k_ref, v_ref, o_ref, m_sc, l_sc, acc_sc):
            body(None, q_ref, k_ref, v_ref, o_ref, m_sc, l_sc, acc_sc)

    return kernel


def multi_head_attention_pallas(queries, keys, values, params, n_heads, mask=None, *,
                                mxu_dtype=jnp.bfloat16):
    """MHA forward. queries (B,Lq,D), keys/values (B,Lk,D).

    params = (wq, bq, wk, bk, wv, bv, wo, bo), weights shaped (d_in, d_out)
    (already transposed relative to torch.nn.Linear.weight).
    mask: optional (B, 1, Lq, Lk) boolean; True positions are masked out.
    mxu_dtype: jnp.bfloat16 (fast, default) or jnp.float32 (exact / HIGHEST).
    """
    wq, bq, wk, bk, wv, bv, wo, bo = params
    B, Lq, D = queries.shape
    Lk = keys.shape[1]
    assert D % n_heads == 0, "d_hidden must be divisible by n_heads"
    dh = D // n_heads
    inv_scale = 1.0 / math.sqrt(D / n_heads)

    exact = jnp.dtype(mxu_dtype) == jnp.dtype(jnp.float32)
    precision = lax.Precision.HIGHEST if exact else None
    approx_recip = not exact
    store_dtype = jnp.float32 if exact else mxu_dtype   # inter-kernel activations

    f32 = jnp.float32
    Rq, Rk = B * Lq, B * Lk
    q2 = queries.reshape(Rq, D)
    k2 = keys.reshape(Rk, D)
    v2 = values.reshape(Rk, D)

    # ---- 1) Fused QKV projection over (batch*len) row tiles -----------------
    TMq = _pick_tile(Rq, 256, 16)
    TMk = _pick_tile(Rk, 256, 16)
    nq_rows, nk_rows = Rq // TMq, Rk // TMk
    n_steps = max(nq_rows, nk_rows)

    qrow_spec = pl.BlockSpec((TMq, D), lambda i: (jnp.minimum(i, nq_rows - 1), 0))
    krow_spec = pl.BlockSpec((TMk, D), lambda i: (jnp.minimum(i, nk_rows - 1), 0))
    w_spec = pl.BlockSpec((D, D), lambda i: (0, 0))
    b_spec = pl.BlockSpec((1, D), lambda i: (0, 0))
    proj_sem = ("parallel",) if nq_rows == nk_rows else ("arbitrary",)

    qp2, kp2, vp2 = pl.pallas_call(
        _make_qkv_kernel(mxu_dtype, precision, inv_scale),
        grid=(n_steps,),
        in_specs=[qrow_spec, krow_spec, krow_spec,
                  w_spec, b_spec, w_spec, b_spec, w_spec, b_spec],
        out_specs=[qrow_spec, krow_spec, krow_spec],
        out_shape=[jax.ShapeDtypeStruct((Rq, D), store_dtype),
                   jax.ShapeDtypeStruct((Rk, D), store_dtype),
                   jax.ShapeDtypeStruct((Rk, D), store_dtype)],
        compiler_params=pltpu.CompilerParams(
            dimension_semantics=proj_sem, vmem_limit_bytes=_VMEM_LIMIT),
    )(q2, k2, v2, wq, bq.reshape(1, D), wk, bk.reshape(1, D), wv, bv.reshape(1, D))

    # ---- 2) Flash-style attention, heads on the grid ------------------------
    BH = B * n_heads

    def split_heads(x2, L):
        return x2.reshape(B, L, n_heads, dh).transpose(0, 2, 1, 3).reshape(BH, L, dh)

    q3, k3, v3 = split_heads(qp2, Lq), split_heads(kp2, Lk), split_heads(vp2, Lk)

    TQ = _pick_tile(Lq, 256, 32)
    TK = _pick_tile(Lk, 512, 128)
    nqt, nkt = Lq // TQ, Lk // TK

    has_mask = mask is not None
    attn_in_specs = []
    attn_args = []
    if has_mask:
        mask_i8 = jnp.asarray(mask).reshape(B, Lq, Lk).astype(jnp.int8)
        attn_in_specs.append(
            pl.BlockSpec((1, TQ, TK), lambda bh, qi, ki: (bh // n_heads, qi, ki)))
        attn_args.append(mask_i8)
    attn_in_specs += [
        pl.BlockSpec((1, TQ, dh), lambda bh, qi, ki: (bh, qi, 0)),
        pl.BlockSpec((1, TK, dh), lambda bh, qi, ki: (bh, ki, 0)),
        pl.BlockSpec((1, TK, dh), lambda bh, qi, ki: (bh, ki, 0)),
    ]
    attn_args += [q3, k3, v3]

    ctx3 = pl.pallas_call(
        _make_attn_kernel(has_mask, mxu_dtype, precision, approx_recip),
        grid=(BH, nqt, nkt),
        in_specs=attn_in_specs,
        out_specs=pl.BlockSpec((1, TQ, dh), lambda bh, qi, ki: (bh, qi, 0)),
        out_shape=jax.ShapeDtypeStruct((BH, Lq, dh), store_dtype),
        scratch_shapes=[pltpu.VMEM((TQ, 1), f32),      # running max
                        pltpu.VMEM((TQ, 1), f32),      # running sum
                        pltpu.VMEM((TQ, dh), f32)],    # un-normalized context
        compiler_params=pltpu.CompilerParams(
            dimension_semantics=("parallel", "parallel", "arbitrary"),
            vmem_limit_bytes=_VMEM_LIMIT),
    )(*attn_args)

    # ---- 3) Merge heads + single full-D output projection -------------------
    ctx2 = ctx3.reshape(B, n_heads, Lq, dh).transpose(0, 2, 1, 3).reshape(Rq, D)

    out2 = pl.pallas_call(
        _make_linear_kernel(mxu_dtype, precision),
        grid=(nq_rows,),
        in_specs=[pl.BlockSpec((TMq, D), lambda i: (i, 0)),
                  pl.BlockSpec((D, D), lambda i: (0, 0)),
                  pl.BlockSpec((1, D), lambda i: (0, 0))],
        out_specs=pl.BlockSpec((TMq, D), lambda i: (i, 0)),
        out_shape=jax.ShapeDtypeStruct((Rq, D), queries.dtype),
        compiler_params=pltpu.CompilerParams(
            dimension_semantics=("parallel",), vmem_limit_bytes=_VMEM_LIMIT),
    )(ctx2, wo, bo.reshape(1, D))

    return out2.reshape(B, Lq, D)


def mha_reference(queries, keys, values, params, n_heads, mask=None):
    """Pure-JAX reference mirroring the PyTorch forward (dropout = identity)."""
    wq, bq, wk, bk, wv, bv, wo, bo = params
    B, Lq, D = queries.shape
    d_head = D // n_heads
    scale = math.sqrt(D / n_heads)
    hp = lax.Precision.HIGHEST

    def proj(x, w, b):
        return jnp.einsum("bld,de->ble", x, w, precision=hp) + b

    def split(x):
        b, l, _ = x.shape
        return x.reshape(b, l, n_heads, d_head).transpose(0, 2, 1, 3)

    qh = split(proj(queries, wq, bq))
    kh = split(proj(keys, wk, bk))
    vh = split(proj(values, wv, bv))

    logits = jnp.einsum("bhqd,bhkd->bhqk", qh, kh, precision=hp) / scale
    if mask is not None:
        logits = jnp.where(mask, _NEG_INF, logits)
    w = jax.nn.softmax(logits, axis=-1)
    ctx = jnp.einsum("bhqk,bhkd->bhqd", w, vh, precision=hp)
    ctx = ctx.transpose(0, 2, 1, 3).reshape(B, Lq, D)
    return jnp.einsum("bld,de->ble", ctx, wo, precision=hp) + bo


if __name__ == "__main__":
    key = jax.random.PRNGKey(0)
    B, Lq, Lk, D, H = 2, 8, 8, 32, 4

    ks = jax.random.split(key, 12)
    q = jax.random.normal(ks[0], (B, Lq, D), jnp.float32)
    k = jax.random.normal(ks[1], (B, Lk, D), jnp.float32)
    v = jax.random.normal(ks[2], (B, Lk, D), jnp.float32)

    bound = 1.0 / math.sqrt(D)
    wq = jax.random.uniform(ks[3], (D, D), jnp.float32, -bound, bound)
    wk = jax.random.uniform(ks[4], (D, D), jnp.float32, -bound, bound)
    wv = jax.random.uniform(ks[5], (D, D), jnp.float32, -bound, bound)
    wo = jax.random.uniform(ks[6], (D, D), jnp.float32, -bound, bound)
    bq = jax.random.uniform(ks[7], (D,), jnp.float32, -bound, bound)
    bk = jax.random.uniform(ks[8], (D,), jnp.float32, -bound, bound)
    bv = jax.random.uniform(ks[9], (D,), jnp.float32, -bound, bound)
    bo = jax.random.uniform(ks[10], (D,), jnp.float32, -bound, bound)
    params = (wq, bq, wk, bk, wv, bv, wo, bo)

    ref = mha_reference(q, k, v, params, H)

    # Fast path: bf16 MXU operands, f32 accumulation (default).
    out = jax.block_until_ready(multi_head_attention_pallas(q, k, v, params, H))
    assert out.shape == (B, Lq, D) and out.dtype == q.dtype
    assert jnp.allclose(out, ref, atol=5e-2, rtol=5e-2), "no-mask bf16 mismatch vs reference"

    # Exact path: f32 operands, HIGHEST precision, tight tolerance.
    out_f32 = jax.block_until_ready(
        multi_head_attention_pallas(q, k, v, params, H, mxu_dtype=jnp.float32))
    assert jnp.allclose(out_f32, ref, atol=1e-4, rtol=1e-4), "no-mask f32 mismatch vs reference"

    # Masked path ((B, 1, Lq, Lk) boolean mask, True == masked out).
    mask = jax.random.uniform(ks[11], (B, 1, Lq, Lk)) > 0.7
    ref_m = mha_reference(q, k, v, params, H, mask=mask)

    out_m = jax.block_until_ready(
        multi_head_attention_pallas(q, k, v, params, H, mask=mask))
    assert jnp.allclose(out_m, ref_m, atol=5e-2, rtol=5e-2), "masked bf16 mismatch vs reference"

    out_mf = jax.block_until_ready(
        multi_head_attention_pallas(q, k, v, params, H, mask=mask, mxu_dtype=jnp.float32))
    assert jnp.allclose(out_mf, ref_m, atol=1e-4, rtol=1e-4), "masked f32 mismatch vs reference"

    print("KERNEL_OK")
</pallas_src>

<mosaic_0001>
module attributes {stable_mosaic.version = 11 : i64} {
  func.func @kernel(%arg0: i32, %arg1: memref<16x32xf32, #tpu.memory_space<vmem>>, %arg2: memref<16x32xf32, #tpu.memory_space<vmem>>, %arg3: memref<16x32xf32, #tpu.memory_space<vmem>>, %arg4: memref<32x32xf32, #tpu.memory_space<vmem>>, %arg5: memref<1x32xf32, #tpu.memory_space<vmem>>, %arg6: memref<32x32xf32, #tpu.memory_space<vmem>>, %arg7: memref<1x32xf32, #tpu.memory_space<vmem>>, %arg8: memref<32x32xf32, #tpu.memory_space<vmem>>, %arg9: memref<1x32xf32, #tpu.memory_space<vmem>>, %arg10: memref<16x32xbf16, #tpu.memory_space<vmem>>, %arg11: memref<16x32xbf16, #tpu.memory_space<vmem>>, %arg12: memref<16x32xbf16, #tpu.memory_space<vmem>>) attributes {dimension_semantics = [#tpu.dimension_semantics<parallel>], iteration_bounds = array<i64: 1>, scalar_prefetch = 0 : i64, scratch_operands = 0 : i64, tpu.core_type = #tpu.core_type<tc>, window_params = [{transform_indices = @transform_0, window_bounds = array<i64: 16, 32>}, {transform_indices = @transform_1, window_bounds = array<i64: 16, 32>}, {transform_indices = @transform_2, window_bounds = array<i64: 16, 32>}, {pipeline_mode = #tpu.pipeline_mode<synchronous>, transform_indices = @transform_3, window_bounds = array<i64: 32, 32>}, {pipeline_mode = #tpu.pipeline_mode<synchronous>, transform_indices = @transform_4, window_bounds = array<i64: 1, 32>}, {pipeline_mode = #tpu.pipeline_mode<synchronous>, transform_indices = @transform_5, window_bounds = array<i64: 32, 32>}, {pipeline_mode = #tpu.pipeline_mode<synchronous>, transform_indices = @transform_6, window_bounds = array<i64: 1, 32>}, {pipeline_mode = #tpu.pipeline_mode<synchronous>, transform_indices = @transform_7, window_bounds = array<i64: 32, 32>}, {pipeline_mode = #tpu.pipeline_mode<synchronous>, transform_indices = @transform_8, window_bounds = array<i64: 1, 32>}, {transform_indices = @transform_9, window_bounds = array<i64: 16, 32>}, {transform_indices = @transform_10, window_bounds = array<i64: 16, 32>}, {transform_indices = @transform_11, window_bounds = array<i64: 16, 32>}]} {
    %c0 = arith.constant 0 : index
    %c0_0 = arith.constant 0 : index
    %0 = vector.load %arg1[%c0, %c0_0] : memref<16x32xf32, #tpu.memory_space<vmem>>, vector<16x32xf32>
    %1 = arith.truncf %0 : vector<16x32xf32> to vector<16x32xbf16>
    %c0_1 = arith.constant 0 : index
    %c0_2 = arith.constant 0 : index
    %2 = vector.load %arg4[%c0_1, %c0_2] : memref<32x32xf32, #tpu.memory_space<vmem>>, vector<32x32xf32>
    %3 = arith.truncf %2 : vector<32x32xf32> to vector<32x32xbf16>
    %cst = arith.constant dense<0.000000e+00> : vector<16x32xf32>
    %4 = tpu.matmul %1, %3, %cst {dimension_numbers = #tpu.dot_dimension_numbers<[1], [0], [0], [1], [0, 0, 1, 1], [], []>} : vector<16x32xbf16>, vector<32x32xbf16>, vector<16x32xf32> -> vector<16x32xf32>
    %c0_3 = arith.constant 0 : index
    %c0_4 = arith.constant 0 : index
    %5 = vector.load %arg5[%c0_3, %c0_4] : memref<1x32xf32, #tpu.memory_space<vmem>>, vector<1x32xf32>
    %6 = vector.broadcast %5 : vector<1x32xf32> to vector<16x32xf32>
    %7 = arith.addf %4, %6 : vector<16x32xf32>
    %cst_5 = arith.constant 0.353553385 : f32
    %8 = vector.broadcast %cst_5 : f32 to vector<16x32xf32>
    %9 = arith.mulf %7, %8 : vector<16x32xf32>
    %10 = arith.truncf %9 : vector<16x32xf32> to vector<16x32xbf16>
    %c0_6 = arith.constant 0 : index
    %c0_7 = arith.constant 0 : index
    %11 = vector.load %arg10[%c0_6, %c0_7] : memref<16x32xbf16, #tpu.memory_space<vmem>>, vector<16x32xbf16>
    tpu.vector_store %arg10[%c0_6, %c0_7], %10 {strides = array<i32>} : memref<16x32xbf16, #tpu.memory_space<vmem>>, vector<16x32xbf16>,
    %c0_8 = arith.constant 0 : index
    %c0_9 = arith.constant 0 : index
    %12 = vector.load %arg2[%c0_8, %c0_9] : memref<16x32xf32, #tpu.memory_space<vmem>>, vector<16x32xf32>
    %13 = arith.truncf %12 : vector<16x32xf32> to vector<16x32xbf16>
    %c0_10 = arith.constant 0 : index
    %c0_11 = arith.constant 0 : index
    %14 = vector.load %arg6[%c0_10, %c0_11] : memref<32x32xf32, #tpu.memory_space<vmem>>, vector<32x32xf32>
    %15 = arith.truncf %14 : vector<32x32xf32> to vector<32x32xbf16>
    %cst_12 = arith.constant dense<0.000000e+00> : vector<16x32xf32>
    %16 = tpu.matmul %13, %15, %cst_12 {dimension_numbers = #tpu.dot_dimension_numbers<[1], [0], [0], [1], [0, 0, 1, 1], [], []>} : vector<16x32xbf16>, vector<32x32xbf16>, vector<16x32xf32> -> vector<16x32xf32>
    %c0_13 = arith.constant 0 : index
    %c0_14 = arith.constant 0 : index
    %17 = vector.load %arg7[%c0_13, %c0_14] : memref<1x32xf32, #tpu.memory_space<vmem>>, vector<1x32xf32>
    %18 = vector.broadcast %17 : vector<1x32xf32> to vector<16x32xf32>
    %19 = arith.addf %16, %18 : vector<16x32xf32>
    %20 = arith.truncf %19 : vector<16x32xf32> to vector<16x32xbf16>
    %c0_15 = arith.constant 0 : index
    %c0_16 = arith.constant 0 : index
    %21 = vector.load %arg11[%c0_15, %c0_16] : memref<16x32xbf16, #tpu.memory_space<vmem>>, vector<16x32xbf16>
    tpu.vector_store %arg11[%c0_15, %c0_16], %20 {strides = array<i32>} : memref<16x32xbf16, #tpu.memory_space<vmem>>, vector<16x32xbf16>,
    %c0_17 = arith.constant 0 : index
    %c0_18 = arith.constant 0 : index
    %22 = vector.load %arg3[%c0_17, %c0_18] : memref<16x32xf32, #tpu.memory_space<vmem>>, vector<16x32xf32>
    %23 = arith.truncf %22 : vector<16x32xf32> to vector<16x32xbf16>
    %c0_19 = arith.constant 0 : index
    %c0_20 = arith.constant 0 : index
    %24 = vector.load %arg8[%c0_19, %c0_20] : memref<32x32xf32, #tpu.memory_space<vmem>>, vector<32x32xf32>
    %25 = arith.truncf %24 : vector<32x32xf32> to vector<32x32xbf16>
    %cst_21 = arith.constant dense<0.000000e+00> : vector<16x32xf32>
    %26 = tpu.matmul %23, %25, %cst_21 {dimension_numbers = #tpu.dot_dimension_numbers<[1], [0], [0], [1], [0, 0, 1, 1], [], []>} : vector<16x32xbf16>, vector<32x32xbf16>, vector<16x32xf32> -> vector<16x32xf32>
    %c0_22 = arith.constant 0 : index
    %c0_23 = arith.constant 0 : index
    %27 = vector.load %arg9[%c0_22, %c0_23] : memref<1x32xf32, #tpu.memory_space<vmem>>, vector<1x32xf32>
    %28 = vector.broadcast %27 : vector<1x32xf32> to vector<16x32xf32>
    %29 = arith.addf %26, %28 : vector<16x32xf32>
    %30 = arith.truncf %29 : vector<16x32xf32> to vector<16x32xbf16>
    %c0_24 = arith.constant 0 : index
    %c0_25 = arith.constant 0 : index
    %31 = vector.load %arg12[%c0_24, %c0_25] : memref<16x32xbf16, #tpu.memory_space<vmem>>, vector<16x32xbf16>
    tpu.vector_store %arg12[%c0_24, %c0_25], %30 {strides = array<i32>} : memref<16x32xbf16, #tpu.memory_space<vmem>>, vector<16x32xbf16>,
    return
  }
  func.func @transform_0(%arg0: i32) -> (i32, i32) {
    %c0_i32 = arith.constant 0 : i32
    %0 = arith.minsi %arg0, %c0_i32 : i32
    %c0_i32_0 = arith.constant 0 : i32
    %c0_i32_1 = arith.constant 0 : i32
    return %0, %c0_i32_0 : i32, i32
  }
  func.func @transform_1(%arg0: i32) -> (i32, i32) {
    %c0_i32 = arith.constant 0 : i32
    %0 = arith.minsi %arg0, %c0_i32 : i32
    %c0_i32_0 = arith.constant 0 : i32
    %c0_i32_1 = arith.constant 0 : i32
    return %0, %c0_i32_0 : i32, i32
  }
  func.func @transform_2(%arg0: i32) -> (i32, i32) {
    %c0_i32 = arith.constant 0 : i32
    %0 = arith.minsi %arg0, %c0_i32 : i32
    %c0_i32_0 = arith.constant 0 : i32
    %c0_i32_1 = arith.constant 0 : i32
    return %0, %c0_i32_0 : i32, i32
  }
  func.func @transform_3(%arg0: i32) -> (i32, i32) {
    %c0_i32 = arith.constant 0 : i32
    %c0_i32_0 = arith.constant 0 : i32
    %c0_i32_1 = arith.constant 0 : i32
    return %c0_i32, %c0_i32_0 : i32, i32
  }
  func.func @transform_4(%arg0: i32) -> (i32, i32) {
    %c0_i32 = arith.constant 0 : i32
    %c0_i32_0 = arith.constant 0 : i32
    %c0_i32_1 = arith.constant 0 : i32
    return %c0_i32, %c0_i32_0 : i32, i32
  }
  func.func @transform_5(%arg0: i32) -> (i32, i32) {
    %c0_i32 = arith.constant 0 : i32
    %c0_i32_0 = arith.constant 0 : i32
    %c0_i32_1 = arith.constant 0 : i32
    return %c0_i32, %c0_i32_0 : i32, i32
  }
  func.func @transform_6(%arg0: i32) -> (i32, i32) {
    %c0_i32 = arith.constant 0 : i32
    %c0_i32_0 = arith.constant 0 : i32
    %c0_i32_1 = arith.constant 0 : i32
    return %c0_i32, %c0_i32_0 : i32, i32
  }
  func.func @transform_7(%arg0: i32) -> (i32, i32) {
    %c0_i32 = arith.constant 0 : i32
    %c0_i32_0 = arith.constant 0 : i32
    %c0_i32_1 = arith.constant 0 : i32
    return %c0_i32, %c0_i32_0 : i32, i32
  }
  func.func @transform_8(%arg0: i32) -> (i32, i32) {
    %c0_i32 = arith.constant 0 : i32
    %c0_i32_0 = arith.constant 0 : i32
    %c0_i32_1 = arith.constant 0 : i32
    return %c0_i32, %c0_i32_0 : i32, i32
  }
  func.func @transform_9(%arg0: i32) -> (i32, i32) {
    %c0_i32 = arith.constant 0 : i32
    %0 = arith.minsi %arg0, %c0_i32 : i32
    %c0_i32_0 = arith.constant 0 : i32
    %c0_i32_1 = arith.constant 0 : i32
    return %0, %c0_i32_0 : i32, i32
  }
  func.func @transform_10(%arg0: i32) -> (i32, i32) {
    %c0_i32 = arith.constant 0 : i32
    %0 = arith.minsi %arg0, %c0_i32 : i32
    %c0_i32_0 = arith.constant 0 : i32
    %c0_i32_1 = arith.constant 0 : i32
    return %0, %c0_i32_0 : i32, i32
  }
  func.func @transform_11(%arg0: i32) -> (i32, i32) {
    %c0_i32 = arith.constant 0 : i32
    %0 = arith.minsi %arg0, %c0_i32 : i32
    %c0_i32_0 = arith.constant 0 : i32
    %c0_i32_1 = arith.constant 0 : i32
    return %0, %c0_i32_0 : i32, i32
  }
}

</mosaic_0001>

<bundles_post_ra>
// kernel: tpu_custom_call.1
= control target key start
LH: loop header
LB: loop body
LE: loop exit
PB: predicated region body
PF: predicated region fallthrough
CT: control target
= control target key end

     0   :  { %17 = vsyncpa [#allocation3], 0  ;;  %s923_s0 = inlined_call_operand.hbm [shape: f32[16,32], index: 0, kind: input, shape index: {}]   ;;  %s924_s1 = inlined_call_operand.hbm [shape: f32[16,32], index: 1, kind: input, shape index: {}]   ;;  %s925_s2 = inlined_call_operand.hbm [shape: f32[16,32], index: 2, kind: input, shape index: {}]   ;;  %s926_s3 = inlined_call_operand.hbm [shape: f32[32,32], index: 3, kind: input, shape index: {}]   ;;  %s927_s4 = inlined_call_operand.vmem [shape: f32[1,32], index: 4, kind: input, shape index: {}]   ;;  %s928_s5 = inlined_call_operand.hbm [shape: f32[32,32], index: 5, kind: input, shape index: {}]   ;;  %s929_s6 = inlined_call_operand.vmem [shape: f32[1,32], index: 6, kind: input, shape index: {}]   ;;  %s930_s7 = inlined_call_operand.hbm [shape: f32[32,32], index: 7, kind: input, shape index: {}]   ;;  %s931_s8 = inlined_call_operand.vmem [shape: f32[1,32], index: 8, kind: input, shape index: {}]   ;;  %s932_s9 = inlined_call_operand.hbm [shape: bf16[16,32], index: 9, kind: output, shape index: {0}]   ;;  %s933_s10 = inlined_call_operand.hbm [shape: bf16[16,32], index: 10, kind: output, shape index: {1}]   ;;  %s934_s11 = inlined_call_operand.hbm [shape: bf16[16,32], index: 11, kind: output, shape index: {2}]  }
   0x1   :  { %18 = vsyncpa [#allocation6], 0 }
   0x2   :  { %19 = vsyncpa [#allocation9], 0 }
   0x3   :  { %20 = vsyncpa [#allocation12], 0 }
   0x4   :  { %21 = vsyncpa [#allocation4], 0 }
   0x5   :  { %22 = vsyncpa [#allocation15], 0  ;;  %s661_s17 = smov [#allocation5]   ;;  %s662_s19 = smov [#allocation8]  }
   0x6   :  { %s40_s18 = sshll.u32 %s661_s17, 4  ;;  %s64_s20 = sshll.u32 %s662_s19, 4  ;;  %s41_s18 = int_to_ptr.vmem [resolvable:$true] %s40_s18  ;;  %s736_s20 = int_to_ptr.vmem [resolvable:$true] %s64_s20 }
   0x7   :  { %s451_s23 = scalar_lea.hbm %s924_s1, 256 }
   0x8   :  { %p452_p0 = scmp.ne.s32.totalorder %s924_s1, %s451_s23  ;;  %p455_p1 = scmp.lt.u32.totalorder %s451_s23, %s924_s1 }
   0xa   :  { %p457_p2 = pnand %p455_p1, %p452_p0 }
   0xc   :  { %460 = shalt.err (!%p457_p2)
}
   0xd   :  { %s461_s28 = scalar_lea.vmem %s41_s18, 256  ;;  %p466_p4 = scmp.lt.s32.totalorder %s41_s18, %s41_s18 }
   0xe   :  { %p462_p3 = scmp.ne.s32.totalorder %s41_s18, %s461_s28  ;;  %p467_p5 = scmp.lt.s32.totalorder %s461_s28, %s461_s28 }
  0x10   :  { %p468_p6 = por %p467_p5, %p466_p4 }
  0x12   :  { %p469_p7 = pnand %p468_p6, %p462_p3 }
  0x14   :  { %472 = shalt.err (!%p469_p7)
}
  0x15   :  { %s663_s29 = smov 128   ;;  %s664_s30 = smov 8  }
  0x16   :  { %46 = dma.hbm_to_vmem [thread:$0]  %s924_s1, 256, %s41_s18, [#allocation6], %s663_s29, %s663_s29, %s664_s30  }
  0x17   :  { %s473_s16 = scalar_lea.hbm %s926_s3, 512 }
  0x18   :  { %p474_p8 = scmp.ne.s32.totalorder %s926_s3, %s473_s16  ;;  %p477_p9 = scmp.lt.u32.totalorder %s473_s16, %s926_s3 }
  0x1a   :  { %p479_p10 = pnand %p477_p9, %p474_p8 }
  0x1c   :  { %482 = shalt.err (!%p479_p10)
}
  0x1d   :  { %s483_s23 = scalar_lea.vmem %s736_s20, 512  ;;  %p488_p12 = scmp.lt.s32.totalorder %s736_s20, %s736_s20 }
  0x1e   :  { %p484_p11 = scmp.ne.s32.totalorder %s736_s20, %s483_s23  ;;  %p489_p13 = scmp.lt.s32.totalorder %s483_s23, %s483_s23 }
  0x20   :  { %p490_p0 = por %p489_p13, %p488_p12 }
  0x22   :  { %p491_p1 = pnand %p490_p0, %p484_p11 }
  0x24   :  { %494 = shalt.err (!%p491_p1)
}
  0x25   :  { %70 = dma.hbm_to_vmem [thread:$0]  %s926_s3, 512, %s736_s20, [#allocation9], %s663_s29, %s663_s29, %s664_s30  }
  0x26   :  { %s665_s24 = smov [#allocation2]   ;;  %s666_s26 = smov [#allocation7]  }
  0x27   :  { %s28_s25 = sshll.u32 %s665_s24, 4  ;;  %s52_s27 = sshll.u32 %s666_s26, 4  ;;  %s29_s25 = int_to_ptr.vmem [resolvable:$true] %s28_s25  ;;  %s773_s27 = int_to_ptr.vmem [resolvable:$true] %s52_s27 }
  0x28   :  { %s495_s13 = scalar_lea.hbm %s923_s0, 256 }
  0x29   :  { %p496_p2 = scmp.ne.s32.totalorder %s923_s0, %s495_s13  ;;  %p499_p3 = scmp.lt.u32.totalorder %s495_s13, %s923_s0 }
  0x2b   :  { %p501_p4 = pnand %p499_p3, %p496_p2 }
  0x2d   :  { %504 = shalt.err (!%p501_p4)
}
  0x2e   :  { %s505_s3 = scalar_lea.vmem %s29_s25, 256  ;;  %p510_p6 = scmp.lt.s32.totalorder %s29_s25, %s29_s25 }
  0x2f   :  { %p506_p5 = scmp.ne.s32.totalorder %s29_s25, %s505_s3  ;;  %p511_p7 = scmp.lt.s32.totalorder %s505_s3, %s505_s3 }
  0x31   :  { %p512_p8 = por %p511_p7, %p510_p6 }
  0x33   :  { %p513_p9 = pnand %p512_p8, %p506_p5 }
  0x35   :  { %516 = shalt.err (!%p513_p9)
}
  0x36   :  { %34 = dma.hbm_to_vmem [thread:$0]  %s923_s0, 256, %s29_s25, [#allocation3], %s663_s29, %s663_s29, %s664_s30  }
  0x37   :  { %s517_s23 = scalar_lea.hbm %s925_s2, 256 }
  0x38   :  { %p518_p10 = scmp.ne.s32.totalorder %s925_s2, %s517_s23  ;;  %p521_p11 = scmp.lt.u32.totalorder %s517_s23, %s925_s2 }
  0x3a   :  { %p523_p12 = pnand %p521_p11, %p518_p10 }
  0x3c   :  { %526 = shalt.err (!%p523_p12)
}
  0x3d   :  { %s527_s28 = scalar_lea.vmem %s773_s27, 256  ;;  %p532_p0 = scmp.lt.s32.totalorder %s773_s27, %s773_s27 }
  0x3e   :  { %p528_p13 = scmp.ne.s32.totalorder %s773_s27, %s527_s28  ;;  %p533_p1 = scmp.lt.s32.totalorder %s527_s28, %s527_s28 }
  0x40   :  { %p534_p2 = por %p533_p1, %p532_p0 }
  0x42   :  { %p535_p3 = pnand %p534_p2, %p528_p13 }
  0x44   :  { %538 = shalt.err (!%p535_p3)
}
  0x45   :  { %58 = dma.hbm_to_vmem [thread:$0]  %s925_s2, 256, %s773_s27, [#allocation6], %s663_s29, %s663_s29, %s664_s30  }
  0x46   :  { %s667_s12 = smov [#allocation10]   ;;  %s668_s14 = smov [#allocation11]  }
  0x47   :  { %s78_s13 = sshll.u32 %s667_s12, 4  ;;  %s92_s15 = sshll.u32 %s668_s14, 4  ;;  %s79_s13 = int_to_ptr.vmem [resolvable:$true] %s78_s13  ;;  %s810_s15 = int_to_ptr.vmem [resolvable:$true] %s92_s15 }
  0x48   :  { %s539_s3 = scalar_lea.hbm %s928_s5, 512 }
  0x49   :  { %p540_p4 = scmp.ne.s32.totalorder %s928_s5, %s539_s3  ;;  %p543_p5 = scmp.lt.u32.totalorder %s539_s3, %s928_s5 }
  0x4b   :  { %p545_p6 = pnand %p543_p5, %p540_p4 }
  0x4d   :  { %548 = shalt.err (!%p545_p6)
}
  0x4e   :  { %s549_s2 = scalar_lea.vmem %s79_s13, 512  ;;  %p554_p8 = scmp.lt.s32.totalorder %s79_s13, %s79_s13 }
  0x4f   :  { %p550_p7 = scmp.ne.s32.totalorder %s79_s13, %s549_s2  ;;  %p555_p9 = scmp.lt.s32.totalorder %s549_s2, %s549_s2 }
  0x51   :  { %p556_p10 = por %p555_p9, %p554_p8 }
  0x53   :  { %p557_p11 = pnand %p556_p10, %p550_p7 }
  0x55   :  { %560 = shalt.err (!%p557_p11)
}
  0x56   :  { %84 = dma.hbm_to_vmem [thread:$0]  %s928_s5, 512, %s79_s13, [#allocation9], %s663_s29, %s663_s29, %s664_s30  }
  0x57   :  { %s561_s24 = scalar_lea.hbm %s930_s7, 512 }
  0x58   :  { %p562_p12 = scmp.ne.s32.totalorder %s930_s7, %s561_s24  ;;  %p565_p13 = scmp.lt.u32.totalorder %s561_s24, %s930_s7 }
  0x5a   :  { %p567_p0 = pnand %p565_p13, %p562_p12 }
  0x5c   :  { %570 = shalt.err (!%p567_p0)
}
  0x5d   :  { %s571_s12 = scalar_lea.vmem %s810_s15, 512  ;;  %p576_p2 = scmp.lt.s32.totalorder %s810_s15, %s810_s15 }
  0x5e   :  { %p572_p1 = scmp.ne.s32.totalorder %s810_s15, %s571_s12  ;;  %p577_p3 = scmp.lt.s32.totalorder %s571_s12, %s571_s12 }
  0x60   :  { %p578_p4 = por %p577_p3, %p576_p2 }
  0x62   :  { %p579_p5 = pnand %p578_p4, %p572_p1 }
  0x64   :  { %582 = shalt.err (!%p579_p5)
}
  0x65   :  { %98 = dma.hbm_to_vmem [thread:$0]  %s930_s7, 512, %s810_s15, [#allocation12], %s663_s29, %s663_s29, %s664_s30  }
  0x66   :  { %649 = dma.done.wait [#allocation3], 256  }
  0x67   :  { %650 = vsyncadd [#allocation3], 4294967040 }
  0x68   :  { %651 = dma.done.wait [#allocation6], 512  }
  0x69   :  { %652 = vsyncadd [#allocation6], 4294966784 }
  0x6a   :  { %653 = dma.done.wait [#allocation9], 1024  }
  0x6b   :  { %654 = vsyncadd [#allocation9], 4294966272 }
  0x6c   :  { %655 = dma.done.wait [#allocation12], 512  }
  0x6d   :  { %656 = vsyncadd [#allocation12], 4294966784  ;;  %v669_v0 = vmov 0.0   ;;  %vm670_vm0 = vmmov 0   ;;  %v123_v1 = vld [vmem:[#allocation8] sm:$0xff]  ;;  %v124_v2 = vld [vmem:[#allocation8 + $0x8] sm:$0xff] }
  0x6e   :  { %412 = vmatprep.subr.bf16.mxu0 %v669_v0  ;;  %420 = vmatprep.subr.bf16.mxu1 %v669_v0  ;;  %v125_v3 = vld [vmem:[#allocation8 + $0x10] sm:$0xff]  ;;  %v127_v4 = vpack.c.bf16 %v124_v2, %v123_v1  ;;  %v126_v5 = vld [vmem:[#allocation8 + $0x18] sm:$0xff]  ;;  %v197_v6 = vld [vmem:[#allocation10] sm:$0xff]  ;;  %vm136_vm1 = vcmask 261120   ;;  %s671_s15 = smov [#allocation14]   ;;  %vm191_vm2 = vcmask 257024  }
  0x6f   :  { %416 = vmatprep.mubr.msk.bf16.mxu0 %vm670_vm0, %v669_v0  ;;  %424 = vmatprep.mubr.msk.bf16.mxu1 %vm670_vm0, %v669_v0  ;;  %v198_v7 = vld [vmem:[#allocation10 + $0x8] sm:$0xff]  ;;  %v120_v9 = vld [vmem:[#allocation2] sm:$0xff]  ;;  %v121_v10 = vld [vmem:[#allocation2 + $0x8] sm:$0xff]  ;;  %v128_v11 = vpack.c.bf16 %v126_v5, %v125_v3  ;;  %s351_s16 = sshll.u32 %s671_s15, 4  ;;  %s673_s20 = smov [#allocation16]   ;;  %s352_s16 = int_to_ptr.vmem [resolvable:$true] %s351_s16 }
  0x70   :  { %v201_v8 = vpack.c.bf16 %v198_v7, %v197_v6  ;;  %413 = vmatpush3.bf16.msra.mxu0 %v127_v4  ;;  %v267_v12 = vld [vmem:[#allocation11] sm:$0xff]  ;;  %v199_v13 = vld [vmem:[#allocation10 + $0x10] sm:$0xff]  ;;  %v200_v14 = vld [vmem:[#allocation10 + $0x18] sm:$0xff]  ;;  %v122_v19 = vpack.c.bf16 %v121_v10, %v120_v9  ;;  %s867_s19 = sshll.u32 %s673_s20, 4  ;;  %s583_s21 = scalar_lea.vmem %s352_s16, 128  ;;  %s364_s19 = int_to_ptr.vmem [resolvable:$true] %s867_s19 }
  0x71   :  { %414 = vmatprep.subr.bf16.mxu0 %v669_v0  ;;  %v268_v15 = vld [vmem:[#allocation11 + $0x8] sm:$0xff]  ;;  %v202_v16 = vpack.c.bf16 %v200_v14, %v199_v13  ;;  %v194_v17 = vld [vmem:[#allocation5] sm:$0xff]  ;;  %v269_v22 = vld [vmem:[#allocation11 + $0x10] sm:$0xff]  ;;  %p584_p6 = scmp.ne.s32.totalorder %s352_s16, %s583_s21  ;;  %p588_p7 = scmp.lt.s32.totalorder %s352_s16, %s352_s16 }
  0x72   :  { %421 = vmatpush3.bf16.msra.mxu1 %v201_v8  ;;  %v195_v18 = vld [vmem:[#allocation5 + $0x8] sm:$0xff]  ;;  %v271_v20 = vpack.c.bf16 %v268_v15, %v267_v12  ;;  %v270_v23 = vld [vmem:[#allocation11 + $0x18] sm:$0xff]  ;;  %v264_v25 = vld [vmem:[#allocation7] sm:$0xff]  ;;  %p589_p8 = scmp.lt.s32.totalorder %s583_s21, %s583_s21 }
  0x73   :  { %422 = vmatprep.subr.bf16.mxu1 %v669_v0  ;;  %v196_v21 = vpack.c.bf16 %v195_v18, %v194_v17  ;;  %v272_v24 = vpack.c.bf16 %v270_v23, %v269_v22  ;;  %v265_v26 = vld [vmem:[#allocation7 + $0x8] sm:$0xff]  ;;  %v385_v28 = vld [vmem:[%s927_s4] ss:$0 sm:$0xff]  ;;  %s672_s4 = smov [#allocation13]  }
  0x74   :  { %415 = vmatpush3.bf16.msra.mxu0 %v128_v11  ;;  %v266_v27 = vpack.c.bf16 %v265_v26, %v264_v25  ;;  %v389_v29 = vld [vmem:[%s929_s6] ss:$0 sm:$0xff]  ;;  %s339_s17 = sshll.u32 %s672_s4, 4  ;;  %p590_p9 = por %p589_p8, %p588_p7  ;;  %s864_s17 = int_to_ptr.vmem [resolvable:$true] %s339_s17 }
  0x75   :  { %428 = vmatprep.subr.bf16.mxu0 %v669_v0  ;;  %v393_v47 = vld [vmem:[%s931_s8] ss:$0 sm:$0xff] }
  0x76   :  { %423 = vmatpush3.bf16.msra.mxu1 %v202_v16  ;;  %p591_p10 = pnand %p590_p9, %p584_p6 }
  0x77   :  { %417 = vmatmul.mubr.msk.bf16.vlgmr.msra.gmra.mrb[0].mxu0 %vm136_vm1, %v122_v19 }
  0x78   :  { %429 = vmatpush3.bf16.msra.mxu0 %v271_v20  ;;  %432 = vmatprep.mubr.msk.bf16.mxu0 %vm670_vm0, %v669_v0 }
  0x79   :  { %425 = vmatmul.mubr.msk.bf16.vlgmr.msra.gmra.mrb[0].mxu1 %vm136_vm1, %v196_v21  ;;  %430 = vmatprep.subr.bf16.mxu0 %v669_v0 }
  0x7c   :  { %431 = vmatpush3.bf16.msra.mxu0 %v272_v24 }
  0x7f   :  { %433 = vmatmul.mubr.msk.bf16.vlgmr.msra.gmra.mrb[4].mxu0 %vm136_vm1, %v266_v27 }
 0x14a   :  { %v174_v30 = vpop.f32.mrb[0].mxu0 }
 0x14b   :  { %v175_v31 = vadd.f32 %v385_v28, %v174_v30  ;;  %v418_v32 = vpop.f32.mrb[1].mxu0 }
 0x14c   :  { %v247_v33 = vpop.f32.mrb[0].mxu1  ;;  %v177_v34 = vpop.f32.mrb[2].mxu0 }
 0x14d   :  { %v248_v35 = vadd.f32 %v389_v29, %v247_v33  ;;  %v426_v36 = vpop.f32.mrb[1].mxu1  ;;  %v181_v37 = vmul.f32 0.35355338, %v175_v31  ;;  %v178_v38 = vadd.f32 %v385_v28, %v177_v34  ;;  %v419_v39 = vpop.f32.mrb[3].mxu0 }
 0x14e   :  { %v250_v40 = vpop.f32.mrb[2].mxu1 }
 0x14f   :  { %v399_v41 = vpack.c.bf16 %v248_v35, %v248_v35  ;;  %v251_v42 = vadd.f32 %v389_v29, %v250_v40  ;;  %v427_v43 = vpop.f32.mrb[3].mxu1  ;;  %v397_v44 = vpack.c.bf16 %v181_v37, %v181_v37  ;;  %v182_v45 = vmul.f32 0.35355338, %v178_v38 }
 0x151   :  { %262 = vst.msk [vmem:[#allocation14] sm:$0xf] %vm191_vm2, %v399_v41  ;;  %v400_v46 = vpack.c.bf16 %v251_v42, %v251_v42  ;;  %192 = vst.msk [vmem:[#allocation13] sm:$0xf] %vm191_vm2, %v397_v44  ;;  %v398_v48 = vpack.c.bf16 %v182_v45, %v182_v45 }
 0x152   :  { %v317_v49 = vpop.f32.mrb[4].mxu0 }
 0x153   :  { %263 = vst.msk [vmem:[#allocation14 + $0x4] sm:$0xf] %vm191_vm2, %v400_v46  ;;  %193 = vst.msk [vmem:[#allocation13 + $0x4] sm:$0xf] %vm191_vm2, %v398_v48  ;;  %v318_v50 = vadd.f32 %v393_v47, %v317_v49  ;;  %v434_v51 = vpop.f32.mrb[5].mxu0 }
 0x154   :  { %594 = shalt.err (!%p591_p10)
}
 0x155   :  { %s595_s2 = scalar_lea.hbm %s933_s10, 128 }
 0x156   :  { %p596_p11 = scmp.ne.s32.totalorder %s933_s10, %s595_s2  ;;  %p599_p12 = scmp.lt.u32.totalorder %s595_s2, %s933_s10 }
 0x158   :  { %p601_p13 = pnand %p599_p12, %p596_p11 }
 0x15a   :  { %604 = shalt.err (!%p601_p13)
}
 0x15b   :  { %s674_s24 = smov 64   ;;  %s675_s26 = smov 4   ;;  %v320_v52 = vpop.f32.mrb[6].mxu0 }
 0x15c   :  { %357 = dma.vmem_to_hbm [thread:$0]  %s352_s16, 128, %s933_s10, [#allocation15], %s674_s24, %s674_s24, %s675_s26  }
 0x15d   :  { %s605_s25 = scalar_lea.vmem %s864_s17, 128  ;;  %p610_p1 = scmp.lt.s32.totalorder %s864_s17, %s864_s17 }
 0x15e   :  { %p606_p0 = scmp.ne.s32.totalorder %s864_s17, %s605_s25  ;;  %p611_p2 = scmp.lt.s32.totalorder %s605_s25, %s605_s25 }
 0x160   :  { %p612_p3 = por %p611_p2, %p610_p1 }
 0x162   :  { %p613_p4 = pnand %p612_p3, %p606_p0 }
 0x164   :  { %616 = shalt.err (!%p613_p4)
}
 0x165   :  { %s617_s13 = scalar_lea.hbm %s932_s9, 128 }
 0x166   :  { %p618_p5 = scmp.ne.s32.totalorder %s932_s9, %s617_s13  ;;  %p621_p6 = scmp.lt.u32.totalorder %s617_s13, %s932_s9 }
 0x168   :  { %p623_p7 = pnand %p621_p6, %p618_p5 }
 0x16a   :  { %626 = shalt.err (!%p623_p7)
}
 0x16b   :  { %345 = dma.vmem_to_hbm [thread:$0]  %s864_s17, 128, %s932_s9, [#allocation4], %s674_s24, %s674_s24, %s675_s26   ;;  %v401_v53 = vpack.c.bf16 %v318_v50, %v318_v50  ;;  %v321_v54 = vadd.f32 %v393_v47, %v320_v52  ;;  %v435_v55 = vpop.f32.mrb[7].mxu0 }
 0x16c   :  { %s627_s16 = scalar_lea.vmem %s364_s19, 128  ;;  %p632_p9 = scmp.lt.s32.totalorder %s364_s19, %s364_s19 }
 0x16d   :  { %332 = vst.msk [vmem:[#allocation16] sm:$0xf] %vm191_vm2, %v401_v53  ;;  %v402_v56 = vpack.c.bf16 %v321_v54, %v321_v54  ;;  %p628_p8 = scmp.ne.s32.totalorder %s364_s19, %s627_s16  ;;  %p633_p10 = scmp.lt.s32.totalorder %s627_s16, %s627_s16 }
 0x16f   :  { %333 = vst.msk [vmem:[#allocation16 + $0x4] sm:$0xf] %vm191_vm2, %v402_v56  ;;  %p634_p11 = por %p633_p10, %p632_p9 }
 0x171   :  { %p635_p12 = pnand %p634_p11, %p628_p8 }
 0x173   :  { %638 = shalt.err (!%p635_p12)
}
 0x174   :  { %s639_s9 = scalar_lea.hbm %s934_s11, 128 }
 0x175   :  { %p640_p13 = scmp.ne.s32.totalorder %s934_s11, %s639_s9  ;;  %p643_p0 = scmp.lt.u32.totalorder %s639_s9, %s934_s11 }
 0x177   :  { %p645_p1 = pnand %p643_p0, %p640_p13 }
 0x179   :  { %648 = shalt.err (!%p645_p1)
}
 0x17a   :  { %369 = dma.vmem_to_hbm [thread:$0]  %s364_s19, 128, %s934_s11, [#allocation15], %s674_s24, %s674_s24, %s675_s26  }
 0x17b   :  { %657 = dma.done.wait [#allocation4], 128  }
 0x17c   :  { %658 = vsyncadd [#allocation4], 4294967168 }
 0x17d   :  { %659 = dma.done.wait [#allocation15], 256  }
 0x17e   :  { %660 = vsyncadd [#allocation15], 4294967040 }
 0x17f   :  { %379 = vsyncpa [#allocation3], 1 }
 0x180   :  { %380 = vsyncpa [#allocation6], 1 }
 0x181   :  { %381 = vsyncpa [#allocation9], 1 }
 0x182   :  { %382 = vsyncpa [#allocation12], 1 }
 0x183   :  { %383 = vsyncpa [#allocation4], 1 }
 0x184   :  { %384 = vsyncpa [#allocation15], 1 }

</bundles_post_ra>
